<compile_context>
chip_gen: v7x
topology: tpu7x:2x2x1
jax: 0.10.0
libtpu: 0.0.40
codegen_flags: <defaults>
</compile_context>

<pallas_src>
import functools

import jax
import jax.numpy as jnp
from jax import lax
from jax.experimental import pallas as pl
from jax.experimental.pallas import tpu as pltpu

BN_EPS = 1e-5


def _residual_block_kernel(x_ref, xid_ref, w1_ref, w2_ref, p1_ref, p2_ref,
                           o_ref, acc_ref):
    # grid = (J output-feature tiles [parallel], K hidden-feature tiles [arbitrary])
    k = pl.program_id(1)

    @pl.when(k == 0)
    def _init():
        acc_ref[...] = jnp.zeros_like(acc_ref)

    # ---- fc1 for hidden tile k: contract the input-feature dim ---------------
    # W1 block is (tk, D) in PyTorch (out, in) layout; contract axis 1 of both.
    x_bf = x_ref[...].astype(jnp.bfloat16)
    h = lax.dot_general(x_bf, w1_ref[...],
                        dimension_numbers=(((1,), (1,)), ((), ())),
                        preferred_element_type=jnp.float32)
    h = h + p1_ref[0:1, :]                                   # bias1

    # ---- bn1 (training-mode batch stats; exact: full batch resident) ---------
    m1 = jnp.mean(h, axis=0, keepdims=True)
    v1 = jnp.maximum(jnp.mean(h * h, axis=0, keepdims=True) - m1 * m1, 0.0)
    h = (h - m1) * lax.rsqrt(v1 + BN_EPS) * p1_ref[1:2, :] + p1_ref[2:3, :]

    # ---- relu ----
    h = jnp.maximum(h, 0.0)

    # ---- fc2 partial sum over hidden tiles (f32 accumulator in VMEM) ---------
    acc_ref[...] += lax.dot_general(h.astype(jnp.bfloat16), w2_ref[...],
                                    dimension_numbers=(((1,), (1,)), ((), ())),
                                    preferred_element_type=jnp.float32)

    @pl.when(k == pl.num_programs(1) - 1)
    def _finish():
        o = acc_ref[...] + p2_ref[0:1, :]                    # bias2
        # bn2 (training-mode batch stats, exact per output feature)
        m2 = jnp.mean(o, axis=0, keepdims=True)
        v2 = jnp.maximum(jnp.mean(o * o, axis=0, keepdims=True) - m2 * m2, 0.0)
        o = (o - m2) * lax.rsqrt(v2 + BN_EPS) * p2_ref[1:2, :] + p2_ref[2:3, :]
        # residual add (identity slice for this output-feature tile) + relu
        o = jnp.maximum(o + xid_ref[...].astype(jnp.float32), 0.0)
        o_ref[...] = o.astype(o_ref.dtype)


def _pick_tile(d, candidates=(512, 256, 128)):
    for c in candidates:
        if d % c == 0:
            return c
    return d


@functools.partial(jax.jit, static_argnames=("tile_j", "tile_k"))
def residual_block(x, w1, b1, g1, be1, w2, b2, g2, be2, *,
                   tile_j=None, tile_k=None):
    """x: (N, D). w1/w2: PyTorch-style (out, in) Linear weights. All float32."""
    n, d = x.shape
    tj = tile_j if tile_j is not None else _pick_tile(d)
    tk = tile_k if tile_k is not None else _pick_tile(d)
    assert d % tj == 0 and d % tk == 0, "feature dim must divide the tile sizes"

    # bf16 weights: native MXU dtype, halves weight DMA bytes & VMEM footprint.
    w1b = w1.astype(jnp.bfloat16)
    w2b = w2.astype(jnp.bfloat16)

    # Pack (bias, gamma, beta) into one (8, D) f32 slab per BN stage
    # (rows 0/1/2; rows 3..7 are sublane padding) -> one DMA instead of three.
    def pack(b, g, be):
        p = jnp.zeros((8, d), jnp.float32)
        return p.at[0].set(b).at[1].set(g).at[2].set(be)

    p1 = pack(b1, g1, be1)   # per hidden feature  (indexed by k)
    p2 = pack(b2, g2, be2)   # per output feature  (indexed by j)

    grid = (d // tj, d // tk)

    # Explicit VMEM budget: double-buffered blocks + f32 accumulator, with headroom.
    itm = jnp.dtype(x.dtype).itemsize
    est = 2 * (n * d * itm            # x (full, resident)
               + n * tj * itm         # identity slice
               + tk * d * 2           # W1 block (bf16)
               + tj * tk * 2          # W2 block (bf16)
               + 8 * tk * 4 + 8 * tj * 4   # packed BN params
               + n * tj * itm)        # output block
    est += n * tj * 4                 # accumulator scratch
    vmem_limit = int(min(max(2 * est, 4 << 20), 64 << 20))

    return pl.pallas_call(
        _residual_block_kernel,
        out_shape=jax.ShapeDtypeStruct((n, d), x.dtype),
        grid_spec=pltpu.PrefetchScalarGridSpec(
            num_scalar_prefetch=0,
            grid=grid,
            in_specs=[
                pl.BlockSpec((n, d), lambda j, k: (0, 0)),    # x (full; fc1 input)
                pl.BlockSpec((n, tj), lambda j, k: (0, j)),   # x identity slice
                pl.BlockSpec((tk, d), lambda j, k: (k, 0)),   # W1 rows = hidden tile
                pl.BlockSpec((tj, tk), lambda j, k: (j, k)),  # W2 [out tile, hid tile]
                pl.BlockSpec((8, tk), lambda j, k: (0, k)),   # b1/g1/be1 packed
                pl.BlockSpec((8, tj), lambda j, k: (0, j)),   # b2/g2/be2 packed
            ],
            out_specs=pl.BlockSpec((n, tj), lambda j, k: (0, j)),
            scratch_shapes=[pltpu.VMEM((n, tj), jnp.float32)],
        ),
        compiler_params=pltpu.CompilerParams(
            dimension_semantics=("parallel", "arbitrary"),
            vmem_limit_bytes=vmem_limit,
        ),
    )(x, x, w1b, w2b, p1, p2)


def _reference(x, w1, b1, g1, be1, w2, b2, g2, be2, *, matmul_dtype=jnp.float32):
    """Pure-JAX reference mirroring the PyTorch forward (training-mode BN)."""
    def dot(a, w):
        return jnp.dot(a.astype(matmul_dtype), w.T.astype(matmul_dtype),
                       preferred_element_type=jnp.float32)

    def bn(h, g, be):
        m = jnp.mean(h, axis=0, keepdims=True)
        v = jnp.mean((h - m) ** 2, axis=0, keepdims=True)
        return (h - m) / jnp.sqrt(v + BN_EPS) * g + be

    h = jax.nn.relu(bn(dot(x, w1) + b1, g1, be1))
    o = bn(dot(h, w2) + b2, g2, be2)
    return jax.nn.relu(o + x)


if __name__ == "__main__":
    # Lane-dense feature dim (multiple of 128); small batch stays un-tiled (BN exact).
    N, D = 16, 256

    key = jax.random.PRNGKey(0)
    ks = jax.random.split(key, 9)

    bound = 1.0 / (D ** 0.5)   # nn.Linear default init scale
    x = jax.random.normal(ks[0], (N, D), dtype=jnp.float32)
    w1 = jax.random.uniform(ks[1], (D, D), jnp.float32, -bound, bound)
    b1 = jax.random.uniform(ks[2], (D,), jnp.float32, -bound, bound)
    w2 = jax.random.uniform(ks[3], (D, D), jnp.float32, -bound, bound)
    b2 = jax.random.uniform(ks[4], (D,), jnp.float32, -bound, bound)
    g1 = 1.0 + 0.1 * jax.random.normal(ks[5], (D,), jnp.float32)
    be1 = 0.1 * jax.random.normal(ks[6], (D,), jnp.float32)
    g2 = 1.0 + 0.1 * jax.random.normal(ks[7], (D,), jnp.float32)
    be2 = 0.1 * jax.random.normal(ks[8], (D,), jnp.float32)

    # 128-wide tiles -> grid (2, 2): exercises the parallel j axis and the
    # k-accumulation / finalize path.
    out = residual_block(x, w1, b1, g1, be1, w2, b2, g2, be2,
                         tile_j=128, tile_k=128)
    out = jax.block_until_ready(out)
    assert out.shape == (N, D)

    # Tight check vs. a reference using the same bf16 matmul numerics.
    ref_bf16 = _reference(x, w1, b1, g1, be1, w2, b2, g2, be2,
                          matmul_dtype=jnp.bfloat16)
    assert jnp.allclose(out, ref_bf16, atol=2e-3, rtol=2e-3), \
        "mismatch vs bf16-matched reference"

    # Sanity check vs. the pure-f32 reference (bf16 MXU rounding tolerance).
    ref_f32 = _reference(x, w1, b1, g1, be1, w2, b2, g2, be2,
                         matmul_dtype=jnp.float32)
    assert jnp.allclose(out, ref_f32, atol=1e-1, rtol=1e-1), \
        "mismatch vs f32 reference"

    print("KERNEL_OK")
</pallas_src>

<mosaic_0001>
module attributes {stable_mosaic.version = 11 : i64} {
  func.func @_residual_block_kernel(%arg0: i32, %arg1: i32, %arg2: memref<16x256xf32, #tpu.memory_space<vmem>>, %arg3: memref<16x128xf32, #tpu.memory_space<vmem>>, %arg4: memref<128x256xbf16, #tpu.memory_space<vmem>>, %arg5: memref<128x128xbf16, #tpu.memory_space<vmem>>, %arg6: memref<8x128xf32, #tpu.memory_space<vmem>>, %arg7: memref<8x128xf32, #tpu.memory_space<vmem>>, %arg8: memref<16x128xf32, #tpu.memory_space<vmem>>, %arg9: memref<16x128xf32, #tpu.memory_space<vmem>>) attributes {dimension_semantics = [#tpu.dimension_semantics<parallel>, #tpu.dimension_semantics<arbitrary>], iteration_bounds = array<i64: 2, 2>, scalar_prefetch = 0 : i64, scratch_operands = 1 : i64, tpu.core_type = #tpu.core_type<tc>, window_params = [{pipeline_mode = #tpu.pipeline_mode<synchronous>, transform_indices = @transform_0, window_bounds = array<i64: 16, 256>}, {transform_indices = @transform_1, window_bounds = array<i64: 16, 128>}, {transform_indices = @transform_2, window_bounds = array<i64: 128, 256>}, {transform_indices = @transform_3, window_bounds = array<i64: 128, 128>}, {transform_indices = @transform_4, window_bounds = array<i64: 8, 128>}, {transform_indices = @transform_5, window_bounds = array<i64: 8, 128>}, {transform_indices = @transform_6, window_bounds = array<i64: 16, 128>}]} {
    %c0_i32 = arith.constant 0 : i32
    %0 = arith.cmpi eq, %arg1, %c0_i32 : i32
    %1 = arith.extui %0 : i1 to i32
    %c0_i32_0 = arith.constant 0 : i32
    %2 = arith.cmpi ne, %1, %c0_i32_0 : i32
    scf.if %2 {
      %cst_23 = arith.constant 0.000000e+00 : f32
      %47 = vector.broadcast %cst_23 : f32 to vector<16x128xf32>
      %c0_24 = arith.constant 0 : index
      %c0_25 = arith.constant 0 : index
      %48 = vector.load %arg9[%c0_24, %c0_25] : memref<16x128xf32, #tpu.memory_space<vmem>>, vector<16x128xf32>
      tpu.vector_store %arg9[%c0_24, %c0_25], %47 {strides = array<i32>} : memref<16x128xf32, #tpu.memory_space<vmem>>, vector<16x128xf32>,
    } else {
    }
    %c0 = arith.constant 0 : index
    %c0_1 = arith.constant 0 : index
    %3 = vector.load %arg2[%c0, %c0_1] : memref<16x256xf32, #tpu.memory_space<vmem>>, vector<16x256xf32>
    %4 = arith.truncf %3 : vector<16x256xf32> to vector<16x256xbf16>
    %c0_2 = arith.constant 0 : index
    %c0_3 = arith.constant 0 : index
    %5 = vector.load %arg4[%c0_2, %c0_3] : memref<128x256xbf16, #tpu.memory_space<vmem>>, vector<128x256xbf16>
    %cst = arith.constant dense<0.000000e+00> : vector<16x128xf32>
    %6 = tpu.matmul %4, %5, %cst {dimension_numbers = #tpu.dot_dimension_numbers<[1], [1], [0], [0], [0, 0, 1, 0], [], []>} : vector<16x256xbf16>, vector<128x256xbf16>, vector<16x128xf32> -> vector<16x128xf32>
    %c0_4 = arith.constant 0 : index
    %c0_5 = arith.constant 0 : index
    %7 = vector.load %arg6[%c0_4, %c0_5] : memref<8x128xf32, #tpu.memory_space<vmem>>, vector<1x128xf32>
    %8 = vector.broadcast %7 : vector<1x128xf32> to vector<16x128xf32>
    %9 = arith.addf %6, %8 : vector<16x128xf32>
    %cst_6 = arith.constant dense<0.000000e+00> : vector<128xf32>
    %10 = vector.multi_reduction <add>, %9, %cst_6 [0] : vector<16x128xf32> to vector<128xf32>
    %11 = vector.shape_cast %10 : vector<128xf32> to vector<1x128xf32>
    %cst_7 = arith.constant 1.600000e+01 : f32
    %12 = vector.broadcast %cst_7 : f32 to vector<1x128xf32>
    %13 = arith.divf %11, %12 : vector<1x128xf32>
    %14 = arith.mulf %9, %9 : vector<16x128xf32>
    %cst_8 = arith.constant dense<0.000000e+00> : vector<128xf32>
    %15 = vector.multi_reduction <add>, %14, %cst_8 [0] : vector<16x128xf32> to vector<128xf32>
    %16 = vector.shape_cast %15 : vector<128xf32> to vector<1x128xf32>
    %cst_9 = arith.constant 1.600000e+01 : f32
    %17 = vector.broadcast %cst_9 : f32 to vector<1x128xf32>
    %18 = arith.divf %16, %17 : vector<1x128xf32>
    %19 = arith.mulf %13, %13 : vector<1x128xf32>
    %20 = arith.subf %18, %19 : vector<1x128xf32>
    %cst_10 = arith.constant 0.000000e+00 : f32
    %21 = vector.broadcast %cst_10 : f32 to vector<1x128xf32>
    %22 = arith.maximumf %20, %21 : vector<1x128xf32>
    %23 = vector.broadcast %13 : vector<1x128xf32> to vector<16x128xf32>
    %24 = arith.subf %9, %23 : vector<16x128xf32>
    %cst_11 = arith.constant 9.99999974E-6 : f32
    %25 = vector.broadcast %cst_11 : f32 to vector<1x128xf32>
    %26 = arith.addf %22, %25 : vector<1x128xf32>
    %27 = math.rsqrt %26 : vector<1x128xf32>
    %28 = vector.broadcast %27 : vector<1x128xf32> to vector<16x128xf32>
    %29 = arith.mulf %24, %28 : vector<16x128xf32>
    %c1 = arith.constant 1 : index
    %c0_12 = arith.constant 0 : index
    %30 = vector.load %arg6[%c1, %c0_12] : memref<8x128xf32, #tpu.memory_space<vmem>>, vector<1x128xf32>
    %31 = vector.broadcast %30 : vector<1x128xf32> to vector<16x128xf32>
    %32 = arith.mulf %29, %31 : vector<16x128xf32>
    %c2 = arith.constant 2 : index
    %c0_13 = arith.constant 0 : index
    %33 = vector.load %arg6[%c2, %c0_13] : memref<8x128xf32, #tpu.memory_space<vmem>>, vector<1x128xf32>
    %34 = vector.broadcast %33 : vector<1x128xf32> to vector<16x128xf32>
    %35 = arith.addf %32, %34 : vector<16x128xf32>
    %cst_14 = arith.constant 0.000000e+00 : f32
    %36 = vector.broadcast %cst_14 : f32 to vector<16x128xf32>
    %37 = arith.maximumf %35, %36 : vector<16x128xf32>
    %c0_15 = arith.constant 0 : index
    %c0_16 = arith.constant 0 : index
    %38 = vector.load %arg9[%c0_15, %c0_16] : memref<16x128xf32, #tpu.memory_space<vmem>>, vector<16x128xf32>
    %39 = arith.truncf %37 : vector<16x128xf32> to vector<16x128xbf16>
    %c0_17 = arith.constant 0 : index
    %c0_18 = arith.constant 0 : index
    %40 = vector.load %arg5[%c0_17, %c0_18] : memref<128x128xbf16, #tpu.memory_space<vmem>>, vector<128x128xbf16>
    %cst_19 = arith.constant dense<0.000000e+00> : vector<16x128xf32>
    %41 = tpu.matmul %39, %40, %cst_19 {dimension_numbers = #tpu.dot_dimension_numbers<[1], [1], [0], [0], [0, 0, 1, 0], [], []>} : vector<16x128xbf16>, vector<128x128xbf16>, vector<16x128xf32> -> vector<16x128xf32>
    %42 = arith.addf %38, %41 : vector<16x128xf32>
    %c0_20 = arith.constant 0 : index
    %c0_21 = arith.constant 0 : index
    %43 = vector.load %arg9[%c0_20, %c0_21] : memref<16x128xf32, #tpu.memory_space<vmem>>, vector<16x128xf32>
    tpu.vector_store %arg9[%c0_20, %c0_21], %42 {strides = array<i32>} : memref<16x128xf32, #tpu.memory_space<vmem>>, vector<16x128xf32>,
    %c1_i32 = arith.constant 1 : i32
    %44 = arith.cmpi eq, %arg1, %c1_i32 : i32
    %45 = arith.extui %44 : i1 to i32
    %c0_i32_22 = arith.constant 0 : i32
    %46 = arith.cmpi ne, %45, %c0_i32_22 : i32
    scf.if %46 {
      %c0_23 = arith.constant 0 : index
      %c0_24 = arith.constant 0 : index
      %47 = vector.load %arg9[%c0_23, %c0_24] : memref<16x128xf32, #tpu.memory_space<vmem>>, vector<16x128xf32>
      %c0_25 = arith.constant 0 : index
      %c0_26 = arith.constant 0 : index
      %48 = vector.load %arg7[%c0_25, %c0_26] : memref<8x128xf32, #tpu.memory_space<vmem>>, vector<1x128xf32>
      %49 = vector.broadcast %48 : vector<1x128xf32> to vector<16x128xf32>
      %50 = arith.addf %47, %49 : vector<16x128xf32>
      %cst_27 = arith.constant dense<0.000000e+00> : vector<128xf32>
      %51 = vector.multi_reduction <add>, %50, %cst_27 [0] : vector<16x128xf32> to vector<128xf32>
      %52 = vector.shape_cast %51 : vector<128xf32> to vector<1x128xf32>
      %cst_28 = arith.constant 1.600000e+01 : f32
      %53 = vector.broadcast %cst_28 : f32 to vector<1x128xf32>
      %54 = arith.divf %52, %53 : vector<1x128xf32>
      %55 = arith.mulf %50, %50 : vector<16x128xf32>
      %cst_29 = arith.constant dense<0.000000e+00> : vector<128xf32>
      %56 = vector.multi_reduction <add>, %55, %cst_29 [0] : vector<16x128xf32> to vector<128xf32>
      %57 = vector.shape_cast %56 : vector<128xf32> to vector<1x128xf32>
      %cst_30 = arith.constant 1.600000e+01 : f32
      %58 = vector.broadcast %cst_30 : f32 to vector<1x128xf32>
      %59 = arith.divf %57, %58 : vector<1x128xf32>
      %60 = arith.mulf %54, %54 : vector<1x128xf32>
      %61 = arith.subf %59, %60 : vector<1x128xf32>
      %cst_31 = arith.constant 0.000000e+00 : f32
      %62 = vector.broadcast %cst_31 : f32 to vector<1x128xf32>
      %63 = arith.maximumf %61, %62 : vector<1x128xf32>
      %64 = vector.broadcast %54 : vector<1x128xf32> to vector<16x128xf32>
      %65 = arith.subf %50, %64 : vector<16x128xf32>
      %cst_32 = arith.constant 9.99999974E-6 : f32
      %66 = vector.broadcast %cst_32 : f32 to vector<1x128xf32>
      %67 = arith.addf %63, %66 : vector<1x128xf32>
      %68 = math.rsqrt %67 : vector<1x128xf32>
      %69 = vector.broadcast %68 : vector<1x128xf32> to vector<16x128xf32>
      %70 = arith.mulf %65, %69 : vector<16x128xf32>
      %c1_33 = arith.constant 1 : index
      %c0_34 = arith.constant 0 : index
      %71 = vector.load %arg7[%c1_33, %c0_34] : memref<8x128xf32, #tpu.memory_space<vmem>>, vector<1x128xf32>
      %72 = vector.broadcast %71 : vector<1x128xf32> to vector<16x128xf32>
      %73 = arith.mulf %70, %72 : vector<16x128xf32>
      %c2_35 = arith.constant 2 : index
      %c0_36 = arith.constant 0 : index
      %74 = vector.load %arg7[%c2_35, %c0_36] : memref<8x128xf32, #tpu.memory_space<vmem>>, vector<1x128xf32>
      %75 = vector.broadcast %74 : vector<1x128xf32> to vector<16x128xf32>
      %76 = arith.addf %73, %75 : vector<16x128xf32>
      %c0_37 = arith.constant 0 : index
      %c0_38 = arith.constant 0 : index
      %77 = vector.load %arg3[%c0_37, %c0_38] : memref<16x128xf32, #tpu.memory_space<vmem>>, vector<16x128xf32>
      %78 = arith.addf %76, %77 : vector<16x128xf32>
      %cst_39 = arith.constant 0.000000e+00 : f32
      %79 = vector.broadcast %cst_39 : f32 to vector<16x128xf32>
      %80 = arith.maximumf %78, %79 : vector<16x128xf32>
      %c0_40 = arith.constant 0 : index
      %c0_41 = arith.constant 0 : index
      %81 = vector.load %arg8[%c0_40, %c0_41] : memref<16x128xf32, #tpu.memory_space<vmem>>, vector<16x128xf32>
      tpu.vector_store %arg8[%c0_40, %c0_41], %80 {strides = array<i32>} : memref<16x128xf32, #tpu.memory_space<vmem>>, vector<16x128xf32>,
    } else {
    }
    return
  }
  func.func @transform_0(%arg0: i32, %arg1: i32) -> (i32, i32) {
    %c0_i32 = arith.constant 0 : i32
    %c0_i32_0 = arith.constant 0 : i32
    %c0_i32_1 = arith.constant 0 : i32
    return %c0_i32, %c0_i32_0 : i32, i32
  }
  func.func @transform_1(%arg0: i32, %arg1: i32) -> (i32, i32) {
    %c0_i32 = arith.constant 0 : i32
    %c0_i32_0 = arith.constant 0 : i32
    return %c0_i32, %arg0 : i32, i32
  }
  func.func @transform_2(%arg0: i32, %arg1: i32) -> (i32, i32) {
    %c0_i32 = arith.constant 0 : i32
    %c0_i32_0 = arith.constant 0 : i32
    return %arg1, %c0_i32 : i32, i32
  }
  func.func @transform_3(%arg0: i32, %arg1: i32) -> (i32, i32) {
    %c0_i32 = arith.constant 0 : i32
    return %arg0, %arg1 : i32, i32
  }
  func.func @transform_4(%arg0: i32, %arg1: i32) -> (i32, i32) {
    %c0_i32 = arith.constant 0 : i32
    %c0_i32_0 = arith.constant 0 : i32
    return %c0_i32, %arg1 : i32, i32
  }
  func.func @transform_5(%arg0: i32, %arg1: i32) -> (i32, i32) {
    %c0_i32 = arith.constant 0 : i32
    %c0_i32_0 = arith.constant 0 : i32
    return %c0_i32, %arg0 : i32, i32
  }
  func.func @transform_6(%arg0: i32, %arg1: i32) -> (i32, i32) {
    %c0_i32 = arith.constant 0 : i32
    %c0_i32_0 = arith.constant 0 : i32
    return %c0_i32, %arg0 : i32, i32
  }
}

</mosaic_0001>

<bundles_post_ra>
// kernel: residual_block.1
= control target key start
LH: loop header
LB: loop body
LE: loop exit
PB: predicated region body
PF: predicated region fallthrough
CT: control target
= control target key end

     0   :  { %s1666_s0 = inlined_call_operand.vmem [shape: f32[16,256], index: 0, kind: input, shape index: {}, may-alias: {0,1}]   ;;  %s1667_s1 = inlined_call_operand.vmem [shape: f32[16,256], index: 1, kind: input, shape index: {}, may-alias: {0,1}]   ;;  %s1668_s2 = inlined_call_operand.vmem [shape: bf16[256,256], index: 2, kind: input, shape index: {}]   ;;  %s1669_s3 = inlined_call_operand.vmem [shape: bf16[256,256], index: 3, kind: input, shape index: {}]   ;;  %s1670_s4 = inlined_call_operand.vmem [shape: f32[8,256], index: 4, kind: input, shape index: {}]   ;;  %s1671_s5 = inlined_call_operand.vmem [shape: f32[8,256], index: 5, kind: input, shape index: {}]   ;;  %s1672_s6 = inlined_call_operand.hbm [shape: f32[16,256], index: 6, kind: output, shape index: {}]  }
   0x1   :  { %1680 = sst [smem:[#allocation16_spill]] %s1667_s1 }
   0x2   :  { %1681 = sst [smem:[#allocation17_spill]] %s1669_s3 }
   0x3   :  { %11 = vsyncpa [#allocation6], 0 }
   0x4   :  { %13 = vsyncpa [#allocation6 + $0x1], 0  ;;  %s1376_s21 = smov 0   ;;  %s1378_s22 = smov 0  }
   0x5   :  { %s1380_s23 = smov 0   ;;  %s1382_s24 = smov 0  }
   0x6   :  { %s1384_s25 = smov 0   ;;  %s1386_s26 = smov 0  }
   0x7   :  { %s1388_s27 = smov 0   ;;  %s1390_s28 = smov 0  }
   0x8   :  { %s1392_s29 = smov 0   ;;  %s1394_s30 = smov 0  }
   0x9 LB: > { %1682 = sst [smem:[#allocation8_spill]] %s1304_s23  ;;  %s1007_s7 = sadd.s32 4294967295, %s1332_s30   ;;  %s1332_s30 = sphi %s1394_s30, %s19_s30   ;;  %s1328_s29 = sphi %s1392_s29, %s1707_s29   ;;  %s1324_s28 = sphi %s1390_s28, %s1703_s28   ;;  %s1320_s27 = sphi %s1388_s27, %s1702_s27   ;;  %s1316_s26 = sphi %s1386_s26, %s1701_s26   ;;  %s1312_s25 = sphi %s1384_s25, %s1700_s25   ;;  %s1308_s24 = sphi %s1382_s24, %s1706_s24   ;;  %s1304_s23 = sphi %s1380_s23, %s1698_s23   ;;  %s1300_s22 = sphi %s1378_s22, %s1697_s22   ;;  %s1296_s21 = sphi %s1376_s21, %s1705_s21  }
   0xa   : > { %1683 = sst [smem:[#allocation9_spill]] %s1312_s25  ;;  %s1008_s8 = sadd.s32 4294967294, %s1332_s30  }
   0xb   : > { %1684 = sst [smem:[#allocation10_spill]] %s1324_s28  ;;  %s28_s9 = sadd.s32 1, %s1324_s28 }
   0xc   : > { %1685 = sst [smem:[#allocation11_spill]] %s1328_s29  ;;  %s31_s10 = sadd.s32 1, %s1328_s29 }
   0xd   : > { %p29_p0 = scmp.ge.s32.totalorder %s28_s9, 2  ;;  %s59_s11 = sadd.s32 1, %s1312_s25 }
   0xe   : > { %p66_p1 = scmp.ne.s32.totalorder %s1312_s25, %s1308_s24  ;;  %p67_p2 = scmp.eq.s32.totalorder %s1332_s30, 0 }
   0xf   : > { %s1709_s9 = smov (%p29_p0, %s28_s9), 0  ;;  %s1711_s10 = smov (!%p29_p0, %s31_s10), %s1328_s29 }
  0x10   : > { %1686 = sst [smem:[#allocation12_spill]] %s1709_s9  ;;  %p1437_p3 = por %p67_p2, %p66_p1 }
  0x11   : > { %s109_s13 = ssub.s32 %s1324_s28, %s1709_s9  ;;  %p33_p4 = scmp.ge.s32.totalorder %s1711_s10, 2 }
  0x12   : > { %s113_s14 = sadd.s32 1, %s1304_s23  ;;  %p120_p5 = scmp.ne.s32.totalorder %s1304_s23, %s1300_s22 }
  0x13   : > { %p202_p6 = scmp.eq.s32.totalorder %s1007_s7, 3  ;;  %s1713_s10 = smov (%p33_p4, %s1711_s10), 0 }
  0x14   : > { %1688 = sst [smem:[#allocation13_spill]] %s1713_s10  ;;  %p1448_p7 = por %p120_p5, %p67_p2 }
  0x15   : > { %p1452_p8 = por %p202_p6, %p66_p1  ;;  %s56_s17 = ssub.s32 %s1328_s29, %s1713_s10 }
  0x16   : > { %p207_p9 = scmp.ne.s32.totalorder %s1308_s24, %s1296_s21  ;;  %p57_p10 = scmp.eq.s32.totalorder %s56_s17, 0 }
  0x17   : > { %s110_s18 = sor.u32 %s109_s13, %s56_s17  ;;  %p208_p12 = scmp.eq.s32.totalorder %s1008_s8, 3 }
  0x18   : > { %p111_p11 = scmp.eq.s32.totalorder %s110_s18, 0  ;;  %p1010_p0 = scmp.ge.s32.totalorder %s1332_s30, 4 }
  0x19   : > { %s1461_s19 = scalar_select %p57_p10, %s1312_s25, %s59_s11  }
  0x1a   : > { %s1464_s20 = scalar_select %p111_p11, %s1304_s23, %s113_s14  }
  0x1b   : > { %1691 = sst [smem:[#allocation14_spill]] %s1461_s19  ;;  %p1466_p13 = por %p208_p12, %p207_p9 }
  0x1c   : > { %1692 = sst [smem:[#allocation15_spill]] %s1464_s20  ;;  %227 = sbr.rel (%p1010_p0) target bundleno = 66 (0x42), region = 20 }
  0x23   : > { %230 = sbr.rel (!%p1437_p3) target bundleno = 46 (0x2e), region = 24  ;;  %s232_s10 = sand.u32 (%p1437_p3), 1, %s1312_s25  }
  0x24   : > { %s1012_s13 = sshll.u32 (%p1437_p3), %s1328_s29, 3  ;;  %s1011_s17 = sshll.u32 (%p1437_p3), %s232_s10, 4 }
  0x25   : > { %s1694_s1 = sld [smem:[#allocation16_spill]] (%p1437_p3)  ;;  %s234_s18 = scalar_lea.vmem (%p1437_p3), [#allocation3], %s1011_s17 }
  0x2b   : > { %s236_s14 = scalar_lea.vmem %s1694_s1, %s1012_s13 }
  0x2c   : > { %v266_v0 = vld [vmem:[%s236_s14] sm:$0xff]  ;;  %v268_v1 = vld [vmem:[%s236_s14 + $0x10] sm:$0xff] }
  0x2d   : > { %267 = vst [vmem:[%s234_s18] sm:$0xff] %v266_v0  ;;  %269 = vst [vmem:[%s234_s18 + $0x8] sm:$0xff] %v268_v1 }
  0x2e PF: > { %285 = sbr.rel (!%p1448_p7) target bundleno = 66 (0x42), region = 66  ;;  %s287_s12 = sand.u32 (%p1448_p7), 1, %s1304_s23  }
  0x2f   : > { %s1062_s9 = sshll.u32 (%p1448_p7), %s1328_s29, 5  ;;  %s1013_s19 = sshll.u32 (%p1448_p7), %s287_s12, 6 }
  0x30   : > { %s292_s10 = sadd.s32 (%p1448_p7), %s1324_s28, %s1062_s9  ;;  %s1695_s3 = sld [smem:[#allocation17_spill]] (%p1448_p7) }
  0x31   : > { %s1016_s25 = sshll.u32 (%p1448_p7), %s292_s10, 2  ;;  %s289_s15 = scalar_lea.vmem (%p1448_p7), [#allocation4], %s1013_s19 }
  0x36   : > { %s1486_s13 = scalar_lea.vmem %s1695_s3, %s1016_s25 }
  0x37   : > { %v310_v2 = vld [vmem:[%s1486_s13] sm:$0xf]  ;;  %v312_v3 = vld [vmem:[%s1486_s13 + $0x8] sm:$0xf]  ;;  %v314_v4 = vld [vmem:[%s1486_s13 + $0x10] sm:$0xf] }
  0x38   : > { %311 = vst [vmem:[%s289_s15] sm:$0xf] %v310_v2  ;;  %313 = vst [vmem:[%s289_s15 + $0x4] sm:$0xf] %v312_v3  ;;  %v316_v5 = vld [vmem:[%s1486_s13 + $0x18] sm:$0xf] }
  0x39   : > { %315 = vst [vmem:[%s289_s15 + $0x8] sm:$0xf] %v314_v4  ;;  %v318_v6 = vld [vmem:[%s1486_s13 + $0x20] sm:$0xf]  ;;  %v320_v7 = vld [vmem:[%s1486_s13 + $0x28] sm:$0xf] }
  0x3a   : > { %317 = vst [vmem:[%s289_s15 + $0xc] sm:$0xf] %v316_v5  ;;  %319 = vst [vmem:[%s289_s15 + $0x10] sm:$0xf] %v318_v6  ;;  %v322_v8 = vld [vmem:[%s1486_s13 + $0x30] sm:$0xf] }
  0x3b   : > { %321 = vst [vmem:[%s289_s15 + $0x14] sm:$0xf] %v320_v7  ;;  %v324_v9 = vld [vmem:[%s1486_s13 + $0x38] sm:$0xf]  ;;  %v326_v10 = vld [vmem:[%s1486_s13 + $0x40] sm:$0xf] }
  0x3c   : > { %323 = vst [vmem:[%s289_s15 + $0x18] sm:$0xf] %v322_v8  ;;  %325 = vst [vmem:[%s289_s15 + $0x1c] sm:$0xf] %v324_v9  ;;  %v328_v11 = vld [vmem:[%s1486_s13 + $0x48] sm:$0xf] }
  0x3d   : > { %327 = vst [vmem:[%s289_s15 + $0x20] sm:$0xf] %v326_v10  ;;  %v330_v12 = vld [vmem:[%s1486_s13 + $0x50] sm:$0xf]  ;;  %v332_v13 = vld [vmem:[%s1486_s13 + $0x58] sm:$0xf] }
  0x3e   : > { %329 = vst [vmem:[%s289_s15 + $0x24] sm:$0xf] %v328_v11  ;;  %331 = vst [vmem:[%s289_s15 + $0x28] sm:$0xf] %v330_v12  ;;  %v334_v14 = vld [vmem:[%s1486_s13 + $0x60] sm:$0xf] }
  0x3f   : > { %333 = vst [vmem:[%s289_s15 + $0x2c] sm:$0xf] %v332_v13  ;;  %v336_v15 = vld [vmem:[%s1486_s13 + $0x68] sm:$0xf]  ;;  %v338_v16 = vld [vmem:[%s1486_s13 + $0x70] sm:$0xf] }
  0x40   : > { %335 = vst [vmem:[%s289_s15 + $0x30] sm:$0xf] %v334_v14  ;;  %337 = vst [vmem:[%s289_s15 + $0x34] sm:$0xf] %v336_v15  ;;  %v340_v17 = vld [vmem:[%s1486_s13 + $0x78] sm:$0xf] }
  0x41   : > { %339 = vst [vmem:[%s289_s15 + $0x38] sm:$0xf] %v338_v16  ;;  %341 = vst [vmem:[%s289_s15 + $0x3c] sm:$0xf] %v340_v17 }
  0x42 PF: > { %p1017_p1 = scmp.ge.s32.totalorder %s1332_s30, 1  ;;  %p409_p2 = scmp.lt.s32.totalorder %s1332_s30, 5 }
  0x44   : > { %p410_p3 = pnand %p1017_p1, %p409_p2 }
  0x45   : > { %s1676_s25 = sand.u32 (!%p410_p3), 1, %s1308_s24   ;;  %s423_s9 = sand.u32 (!%p410_p3), 1, %s1300_s22  }
  0x46   : > { %413 = sbr.rel (%p410_p3) target bundleno = 713 (0x2c9), region = 115  ;;  %s1510_s19 = sshll.u32 (!%p410_p3), %s1676_s25, 4 }
  0x47   : > { %s1019_s20 = sshll.u32 (!%p410_p3), %s423_s9, 6  ;;  %s1021_s17 = sshll.u32 (!%p410_p3), %s1316_s26, 4 }
  0x48   : > { %p471_p4 = scmp.lt.s32.totalorder (!%p410_p3), %s1021_s17, 31  ;;  %p478_p5 = scmp.lt.s32.totalorder (!%p410_p3), %s1316_s26, 1 }
  0x49   : > { %p482_p6 = scmp.lt.s32.totalorder (!%p410_p3), %s1320_s27, 1  ;;  %s418_s28 = scalar_lea.vmem (!%p410_p3), [#allocation3], %s1510_s19 }
  0x4a   : > { %s1536_s23 = scalar_lea.vmem (!%p410_p3), [#allocation5], %s1510_s19  ;;  %p1026_p7 = scmp.ne.s32.totalorder (!%p410_p3), %s1316_s26, 0 }
  0x4d   : > { %s1715_s17 = smov (!%p471_p4, %s1021_s17), 31  ;;  %v1334_v18 = vmov (!%p1026_p7), 0.0  }
  0x4e   : > { %s479_s11 = scalar_select %p478_p5, %s1316_s26, 1 }
  0x4f   : > { %s1063_s14 = sshll.u32 %s1715_s17, 3  ;;  %s1533_s17 = scalar_lea.vmem [#allocation4], %s1019_s20  ;;  %491 = vst [vmem:[#allocation2] sm:$0xff] (!%p1026_p7), %v1334_v18  ;;  %492 = vst [vmem:[#allocation2 + $0x8] sm:$0xff] (!%p1026_p7), %v1334_v18 }
  0x50   : > { %s1519_s10 = scalar_lea.vmem %s1668_s2, %s1063_s14  ;;  %s1024_s8 = sshll.u32 %s479_s11, 3 }
  0x51   : > { %s1524_s15 = scalar_lea.vmem %s1670_s4, %s1024_s8  ;;  %490 = sbr.rel (%p1026_p7) target bundleno = 88 (0x58), region = 127 }
  0x52   : > { %s483_s9 = scalar_select %p482_p6, %s1320_s27, 1 }
  0x54   : > { %s1025_s25 = sshll.u32 %s483_s9, 3 }
  0x55   : > { %s1530_s29 = scalar_lea.vmem %s1671_s5, %s1025_s25 }
  0x58 PF: > { %v1186_v19 = vld [vmem:[%s1519_s10 + $0x4] ss:$8 sps:$4 sm:$0xff]   ;;  %v1188_v20 = vld [vmem:[%s1519_s10] ss:$8 sps:$4 sm:$0xff]   ;;  %v1335_v21 = vmov 0.0   ;;  %v496_v26 = vld [vmem:[%s1666_s0 + $0x18] sm:$0xff] }
  0x59   : > { %1073 = vmatprep.subr.bf16.mxu1 %v1335_v21  ;;  %600 = vmatprep.subr.bf16.mxu0 %v1186_v19  ;;  %v1189_v22 = vld [vmem:[%s1519_s10 + $0x14] ss:$8 sps:$4 sm:$0xff]   ;;  %v1191_v23 = vld [vmem:[%s1519_s10 + $0x10] ss:$8 sps:$4 sm:$0xff]   ;;  %v1192_v24 = vld [vmem:[%s1519_s10 + $0x24] ss:$8 sps:$4 sm:$0xff]  }
  0x5a   : > { %601 = vmatpush1.bf16.xpose.msra.mxu0 %v1188_v20  ;;  %v494_v25 = vld [vmem:[%s1666_s0 + $0x8] sm:$0xff]  ;;  %v1210_v28 = vld [vmem:[%s1533_s17] sm:$0xff]   ;;  %v1211_v31 = vld [vmem:[%s1533_s17 + $0x8] sm:$0xff]   ;;  %vm1336_vm0 = vmmov 0   ;;  %p1054_p9 = scmp.ne.s32.totalorder %s1316_s26, 1 }
  0x5b   : > { %602 = vmatprep.subr.bf16.mxu0 %v1189_v22  ;;  %v498_v27 = vpack.c.bf16 %v496_v26, %v494_v25  ;;  %v1194_v29 = vld [vmem:[%s1519_s10 + $0x20] ss:$8 sps:$4 sm:$0xff]   ;;  %v1195_v30 = vld [vmem:[%s1519_s10 + $0x34] ss:$8 sps:$4 sm:$0xff]   ;;  %1074 = vmatpush3.bf16.xpose.msra.mxu1 %v1210_v28  ;;  %v1197_v32 = vld [vmem:[%s1519_s10 + $0x30] ss:$8 sps:$4 sm:$0xff]  }
  0x5c   : > { %1075 = vmatprep.subr.bf16.mxu1 %v1335_v21  ;;  %v1198_v33 = vld [vmem:[%s1519_s10 + $0x44] ss:$8 sps:$4 sm:$0xff]   ;;  %v1200_v34 = vld [vmem:[%s1519_s10 + $0x40] ss:$8 sps:$4 sm:$0xff]   ;;  %v1201_v35 = vld [vmem:[%s1519_s10 + $0x54] ss:$8 sps:$4 sm:$0xff]   ;;  %1089 = vmatprep.mubr.msk.bf16.mxu1 %vm1336_vm0, %v1335_v21 }
  0x5d   : > { %632 = vmatprep.mubr.bf16.mxu0 %v498_v27  ;;  %v1203_v36 = vld [vmem:[%s1519_s10 + $0x50] ss:$8 sps:$4 sm:$0xff]   ;;  %v1204_v37 = vld [vmem:[%s1519_s10 + $0x64] ss:$8 sps:$4 sm:$0xff]   ;;  %v1206_v38 = vld [vmem:[%s1519_s10 + $0x60] ss:$8 sps:$4 sm:$0xff]  }
  0x5e   : > { %v1207_v39 = vld [vmem:[%s1519_s10 + $0x74] ss:$8 sps:$4 sm:$0xff]   ;;  %v1209_v40 = vld [vmem:[%s1519_s10 + $0x70] ss:$8 sps:$4 sm:$0xff]   ;;  %v493_v41 = vld [vmem:[%s1666_s0] sm:$0xff] }
  0x5f   : > { %v495_v42 = vld [vmem:[%s1666_s0 + $0x10] sm:$0xff]  ;;  %v1212_v44 = vld [vmem:[%s1533_s17 + $0x10] sm:$0xff]   ;;  %v1213_v45 = vld [vmem:[%s1533_s17 + $0x18] sm:$0xff]  }
  0x60   : > { %v497_v43 = vpack.c.bf16 %v495_v42, %v493_v41  ;;  %v1214_v46 = vld [vmem:[%s1533_s17 + $0x20] sm:$0xff]   ;;  %v1215_v47 = vld [vmem:[%s1533_s17 + $0x28] sm:$0xff]   ;;  %v1216_v48 = vld [vmem:[%s1533_s17 + $0x30] sm:$0xff]  }
  0x61   : > { %v1217_v49 = vld [vmem:[%s1533_s17 + $0x38] sm:$0xff]   ;;  %v1027_v50 = vld [vmem:[%s1524_s15] ss:$0 sm:$0xff]  ;;  %v1044_v18 = vld [vmem:[%s1524_s15 + $0x1] ss:$0 sm:$0xff] }
  0x62   : > { %603 = vmatpush1.bf16.xpose.msra.mxu0 %v1191_v23 }
  0x63   : > { %604 = vmatprep.subr.bf16.mxu0 %v1192_v24  ;;  %1076 = vmatpush3.bf16.xpose.msra.mxu1 %v1211_v31  ;;  %v686_v31 = vld [vmem:[#allocation2 + $0x8] sm:$0xff] }
  0x64   : > { %1077 = vmatprep.subr.bf16.mxu1 %v1335_v21 }
  0x6a   : > { %605 = vmatpush1.bf16.xpose.msra.mxu0 %v1194_v29  ;;  %v685_v29 = vld [vmem:[#allocation2] sm:$0xff] }
  0x6b   : > { %606 = vmatprep.subr.bf16.mxu0 %v1195_v30  ;;  %1078 = vmatpush3.bf16.xpose.msra.mxu1 %v1212_v44 }
  0x6c   : > { %1079 = vmatprep.subr.bf16.mxu1 %v1335_v21 }
  0x72   : > { %607 = vmatpush1.bf16.xpose.msra.mxu0 %v1197_v32 }
  0x73   : > { %608 = vmatprep.subr.bf16.mxu0 %v1198_v33  ;;  %1080 = vmatpush3.bf16.xpose.msra.mxu1 %v1213_v45 }
  0x74   : > { %1081 = vmatprep.subr.bf16.mxu1 %v1335_v21 }
  0x7a   : > { %609 = vmatpush1.bf16.xpose.msra.mxu0 %v1200_v34 }
  0x7b   : > { %610 = vmatprep.subr.bf16.mxu0 %v1201_v35  ;;  %1082 = vmatpush3.bf16.xpose.msra.mxu1 %v1214_v46 }
  0x7c   : > { %1083 = vmatprep.subr.bf16.mxu1 %v1335_v21 }
  0x82   : > { %611 = vmatpush1.bf16.xpose.msra.mxu0 %v1203_v36 }
  0x83   : > { %612 = vmatprep.subr.bf16.mxu0 %v1204_v37  ;;  %1084 = vmatpush3.bf16.xpose.msra.mxu1 %v1215_v47 }
  0x84   : > { %1085 = vmatprep.subr.bf16.mxu1 %v1335_v21 }
  0x8a   : > { %613 = vmatpush1.bf16.xpose.msra.mxu0 %v1206_v38 }
  0x8b   : > { %614 = vmatprep.subr.bf16.mxu0 %v1207_v39  ;;  %1086 = vmatpush3.bf16.xpose.msra.mxu1 %v1216_v48  ;;  %v1055_v39 = vld [vmem:[%s1530_s29] ss:$0 sm:$0xff] (!%p1054_p9) }
  0x8c   : > { %1087 = vmatprep.subr.bf16.mxu1 %v1335_v21  ;;  %v1045_v21 = vld [vmem:[%s1524_s15 + $0x2] ss:$0 sm:$0xff] }
  0x92   : > { %615 = vmatpush1.bf16.xpose.msra.mxu0 %v1209_v40 }
  0x93   : > { %1088 = vmatpush3.bf16.xpose.msra.mxu1 %v1217_v49 }
  0x99   : > { %633 = vmatmul.mubr.bf16.vlgmr.msra.gmra.mrb[0].mxu0 %v497_v43 }
 0x16c   : > { %v634_v51 = vpop.f32.mrb[0].mxu0 }
 0x16d   : > { %v635_v52 = vadd.f32 %v1027_v50, %v634_v51  ;;  %v636_v53 = vpop.f32.mrb[1].mxu0 }
 0x16e   : > { %v637_v54 = vpop.f32.mrb[2].mxu0 }
 0x16f   : > { %v638_v55 = vadd.f32 %v1027_v50, %v637_v54  ;;  %v639_v56 = vpop.f32.mrb[3].mxu0  ;;  %v650_v57 = vmul.f32 %v635_v52, %v635_v52 }
 0x171   : > { %v641_v58 = vadd.f32 %v638_v55, %v635_v52  ;;  %v651_v59 = vmul.f32 %v638_v55, %v638_v55 }
 0x173   : > { %v642_v60 = vrot.slane %v641_v58, 4  ;;  %v652_v61 = vadd.f32 %v651_v59, %v650_v57 }
 0x175   : > { %v643_v62 = vadd.f32 %v642_v60, %v641_v58  ;;  %v653_v63 = vrot.slane %v652_v61, 4 }
 0x177   : > { %v644_v0 = vrot.slane %v643_v62, 2  ;;  %v654_v1 = vadd.f32 %v653_v63, %v652_v61 }
 0x179   : > { %v645_v2 = vadd.f32 %v644_v0, %v643_v62  ;;  %v655_v3 = vrot.slane %v654_v1, 2 }
 0x17b   : > { %v646_v4 = vrot.slane %v645_v2, 1  ;;  %v656_v5 = vadd.f32 %v655_v3, %v654_v1  ;;  %v1056_v3 = vld [vmem:[%s1530_s29 + $0x1] ss:$0 sm:$0xff] (!%p1054_p9) }
 0x17d   : > { %v647_v6 = vadd.f32 %v646_v4, %v645_v2  ;;  %v657_v7 = vrot.slane %v656_v5, 1 }
 0x17f   : > { %v649_v8 = vmul.f32 0.0625, %v647_v6  ;;  %v658_v9 = vadd.f32 %v657_v7, %v656_v5  ;;  %v1057_v6 = vld [vmem:[%s1530_s29 + $0x2] ss:$0 sm:$0xff] (!%p1054_p9) }
 0x181   : > { %v659_v10 = vmul.f32 0.0625, %v658_v9  ;;  %v660_v11 = vmul.f32 %v649_v8, %v649_v8  ;;  %v664_v12 = vsub.f32 %v638_v55, %v649_v8  ;;  %v663_v13 = vsub.f32 %v635_v52, %v649_v8  ;;  %v851_v9 = vld [vmem:[%s418_s28] sm:$0xff] (!%p1054_p9) }
 0x183   : > { %v661_v14 = vsub.f32 %v659_v10, %v660_v11  ;;  %v852_v10 = vld [vmem:[%s418_s28 + $0x8] sm:$0xff] (!%p1054_p9) }
 0x185   : > { %v662_v15 = vmax.f32 %v661_v14, 0.0 }
 0x187   : > { %v665_v16 = vadd.f32 1e-05, %v662_v15 }
 0x189   : > { %1218 = vrsqrt.f32 %v665_v16 }
 0x193   : > { %v1219_v17 = vpop.eup %1218 }
 0x194   : > { %v668_v19 = vmul.f32 %v1219_v17, %v664_v12  ;;  %v667_v20 = vmul.f32 %v1219_v17, %v663_v13 }
 0x196   : > { %v674_v22 = vmul.f32 %v1044_v18, %v667_v20  ;;  %v675_v23 = vmul.f32 %v1044_v18, %v668_v19 }
 0x198   : > { %v681_v24 = vadd.f32 %v1045_v21, %v674_v22  ;;  %v682_v25 = vadd.f32 %v1045_v21, %v675_v23 }
 0x19a   : > { %v683_v26 = vmax.f32 %v681_v24, 0.0  ;;  %v684_v27 = vmax.f32 %v682_v25, 0.0 }
 0x19c   : > { %v687_v28 = vpack.c.bf16 %v684_v27, %v683_v26 }
 0x19e   : > { %1090 = vmatmul.mubr.bf16.vlgmr.msra.gmra.mrb[0].mxu1 %v687_v28 }
 0x270   : > { %800 = sbr.rel (%p1054_p9) target bundleno = 686 (0x2ae), region = 131 }
 0x271   : > { %v786_v30 = vpop.f32.mrb[0].mxu1 }
 0x272   : > { %v793_v32 = vadd.f32 %v786_v30, %v685_v29  ;;  %v1091_v33 = vpop.f32.mrb[1].mxu1 }
 0x273   : > { %v789_v34 = vpop.f32.mrb[2].mxu1 }
 0x274   : > { %795 = vst [vmem:[#allocation2] sm:$0xff] %v793_v32  ;;  %v794_v35 = vadd.f32 %v789_v34, %v686_v31  ;;  %v1092_v36 = vpop.f32.mrb[3].mxu1 }
 0x276   : > { %796 = vst [vmem:[#allocation2 + $0x8] sm:$0xff] %v794_v35 }
 0x27b   : > { %v801_v37 = vld [vmem:[#allocation2] sm:$0xff] }
 0x27c   : > { %v808_v40 = vadd.f32 %v1055_v39, %v801_v37 }
 0x27d   : > { %v802_v38 = vld [vmem:[#allocation2 + $0x8] sm:$0xff] }
 0x27e   : > { %v809_v41 = vadd.f32 %v1055_v39, %v802_v38  ;;  %v818_v43 = vmul.f32 %v808_v40, %v808_v40 }
 0x280   : > { %v810_v42 = vadd.f32 %v809_v41, %v808_v40  ;;  %v819_v44 = vmul.f32 %v809_v41, %v809_v41 }
 0x282   : > { %v811_v45 = vrot.slane %v810_v42, 4  ;;  %v820_v46 = vadd.f32 %v819_v44, %v818_v43 }
 0x284   : > { %v812_v47 = vadd.f32 %v811_v45, %v810_v42  ;;  %v821_v48 = vrot.slane %v820_v46, 4 }
 0x286   : > { %v813_v49 = vrot.slane %v812_v47, 2  ;;  %v822_v50 = vadd.f32 %v821_v48, %v820_v46 }
 0x288   : > { %v814_v51 = vadd.f32 %v813_v49, %v812_v47  ;;  %v823_v52 = vrot.slane %v822_v50, 2 }
 0x28a   : > { %v815_v53 = vrot.slane %v814_v51, 1  ;;  %v824_v54 = vadd.f32 %v823_v52, %v822_v50 }
 0x28c   : > { %v816_v55 = vadd.f32 %v815_v53, %v814_v51  ;;  %v825_v56 = vrot.slane %v824_v54, 1 }
 0x28e   : > { %v817_v57 = vmul.f32 0.0625, %v816_v55  ;;  %v826_v58 = vadd.f32 %v825_v56, %v824_v54 }
 0x290   : > { %v827_v59 = vmul.f32 0.0625, %v826_v58  ;;  %v828_v60 = vmul.f32 %v817_v57, %v817_v57  ;;  %v831_v0 = vsub.f32 %v808_v40, %v817_v57  ;;  %v832_v1 = vsub.f32 %v809_v41, %v817_v57 }
 0x292   : > { %v829_v61 = vsub.f32 %v827_v59, %v828_v60 }
 0x294   : > { %v830_v62 = vmax.f32 %v829_v61, 0.0 }
 0x296   : > { %v833_v63 = vadd.f32 1e-05, %v830_v62 }
 0x298   : > { %1220 = vrsqrt.f32 %v833_v63 }
 0x2a2   : > { %v1221_v2 = vpop.eup %1220 }
 0x2a3   : > { %v835_v4 = vmul.f32 %v1221_v2, %v831_v0  ;;  %v836_v5 = vmul.f32 %v1221_v2, %v832_v1 }
 0x2a5   : > { %v842_v7 = vmul.f32 %v1056_v3, %v835_v4  ;;  %v843_v8 = vmul.f32 %v1056_v3, %v836_v5 }
 0x2a7   : > { %v849_v11 = vadd.f32 %v1057_v6, %v842_v7  ;;  %v850_v12 = vadd.f32 %v1057_v6, %v843_v8 }
 0x2a9   : > { %v853_v13 = vadd.f32 %v851_v9, %v849_v11  ;;  %v854_v14 = vadd.f32 %v852_v10, %v850_v12 }
 0x2ab   : > { %v855_v15 = vmax.f32 %v853_v13, 0.0  ;;  %v856_v16 = vmax.f32 %v854_v14, 0.0 }
 0x2ad   : > { %857 = vst [vmem:[%s1536_s23] sm:$0xff] %v855_v15  ;;  %858 = vst [vmem:[%s1536_s23 + $0x8] sm:$0xff] %v856_v16 }
 0x2ae PF: > { %s1059_s26 = sshll.u32 %s1320_s27, 7  ;;  %s872_s28 = sshll.u32 %s1536_s23, 4  ;;  %s1604_s28 = int_to_ptr.vmem [resolvable:$true] %s872_s28 }
 0x2af   : > { %s1601_s8 = scalar_lea.hbm %s1672_s6, %s1059_s26  ;;  %s1696_s19 = sand.u32 1, %s1308_s24  }
 0x2b0   : > { %s1608_s22 = scalar_lea.sflag [#allocation6], %s1696_s19  ;;  %s1222_s13 = scalar_lea.vmem %s1604_s28, 256 }
 0x2b1   : > { %p1223_p10 = scmp.ne.s32.totalorder %s1604_s28, %s1222_s13  ;;  %s1337_s27 = smov [#allocation5]  }
 0x2b2   : > { %s1226_s15 = sshll.u32 %s1337_s27, 4  ;;  %s1227_s15 = int_to_ptr.vmem [resolvable:$false] %s1226_s15 }
 0x2b3   : > { %p1224_p11 = pnand %p1223_p10, %p1452_p8  ;;  %s1228_s9 = scalar_lea.vmem %s1227_s15, 512 }
 0x2b4   : > { %p1229_p0 = scmp.lt.s32.totalorder %s1604_s28, %s1227_s15  ;;  %p1230_p1 = scmp.lt.s32.totalorder %s1228_s9, %s1222_s13 }
 0x2b5   : > { %p1225_p12 = pneg %p1224_p11 }
 0x2b6   : > { %p1231_p2 = por %p1230_p1, %p1229_p0 }
 0x2b8   : > { %p1232_p3 = pnand %p1231_p2, %p1225_p12 }
 0x2ba   : > { %1235 = shalt.err (!%p1232_p3)
}
 0x2bb   : > { %s1236_s23 = scalar_lea.hbm %s1601_s8, 256  ;;  %s1240_s3 = scalar_lea.hbm %s1672_s6, 512 }
 0x2bc   : > { %p1237_p4 = scmp.ne.s32.totalorder %s1601_s8, %s1236_s23  ;;  %p1241_p7 = scmp.lt.u32.totalorder %s1601_s8, %s1672_s6 }
 0x2bd   : > { %p1242_p9 = scmp.lt.u32.totalorder %s1240_s3, %s1236_s23  ;;  %p1244_p11 = scmp.lt.u32.totalorder %s1236_s23, %s1601_s8 }
 0x2be   : > { %p1238_p5 = pnand %p1237_p4, %p1452_p8 }
 0x2bf   : > { %p1243_p10 = por %p1242_p9, %p1241_p7 }
 0x2c0   : > { %p1239_p6 = pneg %p1238_p5 }
 0x2c1   : > { %p1245_p12 = por %p1244_p11, %p1243_p10 }
 0x2c3   : > { %p1246_p0 = pnand %p1245_p12, %p1239_p6 }
 0x2c5   : > { %1249 = shalt.err (!%p1246_p0)
}
 0x2c6   : > { %s1338_s11 = smov 128   ;;  %s1339_s14 = smov 256  }
 0x2c7   : > { %s1340_s18 = smov 8  }
 0x2c8   : > { %1093 = dma.vmem_to_hbm [thread:$0]  (%p1452_p8), %s1604_s28, 256, %s1601_s8, %s1608_s22, %s1338_s11, %s1339_s14, %s1340_s18  }
 0x2c9 PF: > { %p1099_p1 = scmp.ge.s32.totalorder %s1332_s30, 2  ;;  %s887_s12 = sand.u32 1, %s1296_s21  }
 0x2ca   : > { %s888_s26 = scalar_lea.sflag [#allocation6], %s887_s12 }
 0x2cb   : > { %p1096_p2 = pnand %p1099_p1, %p1466_p13 }
 0x2cd   : > { %1291 = dma.done.wait (!%p1096_p2), %s888_s26, 256  }
 0x2ce   : > { %1293 = vsyncadd (!%p1096_p2), %s888_s26, 4294967040  ;;  %s19_s30 = sadd.s32 1, %s1332_s30   ;;  %s1697_s22 = sld [smem:[#allocation8_spill]] }
 0x2cf   : > { %p16_p3 = scmp.ge.s32.totalorder %s19_s30, 6   ;;  %s1698_s23 = sld [smem:[#allocation15_spill]] }
 0x2d0   : > { %s1699_s29 = sld [smem:[#allocation9_spill]]  ;;  %s1700_s25 = sld [smem:[#allocation14_spill]] }
 0x2d1   : > { %s1701_s26 = sld [smem:[#allocation10_spill]]  ;;  %s1702_s27 = sld [smem:[#allocation11_spill]] }
 0x2d2   : > { %s1703_s28 = sld [smem:[#allocation12_spill]]  ;;  %s1704_s16 = sld [smem:[#allocation13_spill]] }
 0x2d3   : > { %s1705_s21 = smov %s1308_s24  ;;  %18 = sbr.rel (!%p16_p3) target bundleno = 9 (0x9), region = 188 }
 0x2d6   : > { %s1706_s24 = smov %s1699_s29 }
 0x2d8   : > { %s1707_s29 = smov %s1704_s16 }
 0x2da   :  { %893 = vsyncpa [#allocation6], 1 }
 0x2db   :  { %895 = vsyncpa [#allocation6 + $0x1], 1 }

</bundles_post_ra>
